<compile_context>
chip_gen: v7x
topology: tpu7x:2x2x1
jax: 0.10.0
libtpu: 0.0.40
codegen_flags: <defaults>
</compile_context>

<pallas_src>
import functools

import jax
import jax.numpy as jnp
import numpy as np
from jax.experimental import pallas as pl
from jax.experimental.pallas import tpu as pltpu

EPS = 1e-5
LANE = 128


def _round_up(x, m):
    return (x + m - 1) // m * m


def _conv_block_kernel(x_ref, w1_ref, b1_ref, w2sc_ref, bout_ref, out_ref, *, L):
    """One grid step = a block of whole batch elements, rows flattened to block_n*L.

    x_ref    : (BLK, Cin_p)    f32   activations, channels lane-dense
    w1_ref   : (3*Cin_p, Cin_p)      conv1 weights (BN1 folded), k=3 taps stacked on rows
    b1_ref   : (1, Cin_p)      f32   BN1 bias (b - m*scale)
    w2sc_ref : (4*Cin_p, Cout_p)     [conv2 taps (BN2 folded) ; shortcut W^T]
    bout_ref : (1, Cout_p)     f32   BN2 bias + shortcut bias (fused)
    out_ref  : (BLK, Cout_p)   f32
    """
    x = x_ref[...]
    blk = x.shape[0]

    # Row index inside the block.  BLK is a multiple of L, so (row % L) is the
    # position within each batch element.  The masks implement the k=3, pad=1
    # zero boundary AND stop pltpu.roll from leaking rows across batch elements
    # or around the block wrap.
    row = jax.lax.broadcasted_iota(jnp.int32, (blk, 1), 0)
    not_first = (row % L) != 0
    not_last = (row % L) != (L - 1)

    def shifts(a):
        prev = jnp.where(not_first, pltpu.roll(a, 1, axis=0), 0.0)       # a[l-1]
        nxt = jnp.where(not_last, pltpu.roll(a, blk - 1, axis=0), 0.0)   # a[l+1]
        return prev, nxt

    # --- Conv1 (+ folded BN1) as a single MXU matmul over (BLK, 3*Cin_p) ---
    xp, xn = shifts(x)
    x3 = jnp.concatenate([xp, x, xn], axis=1).astype(w1_ref.dtype)
    h = jnp.dot(x3, w1_ref[...], preferred_element_type=jnp.float32) + b1_ref[...]
    h = jnp.maximum(h, 0.0)                                              # ReLU

    # --- Conv2 (+ folded BN2) and shortcut Linear share one matmul ---
    #   [h_prev | h | h_next | x] @ [w2_k0 ; w2_k1 ; w2_k2 ; Wsc^T] + fused bias
    hp, hn = shifts(h)
    hx = jnp.concatenate([hp, h, hn, x], axis=1).astype(w2sc_ref.dtype)
    y = jnp.dot(hx, w2sc_ref[...], preferred_element_type=jnp.float32) + bout_ref[...]

    out_ref[...] = y.astype(out_ref.dtype)


def conv_block_forward(x, params, *, mxu_dtype=jnp.bfloat16):
    """x: (..., C_in, L) float32.  Returns (..., C_out, L) float32 (eval-mode BN)."""
    lead = x.shape[:-2]
    C_in, L = x.shape[-2], x.shape[-1]
    C_out = params["w2"].shape[0]
    x3d = x.reshape((-1, C_in, L))
    N = x3d.shape[0]

    Cin_p = _round_up(C_in, LANE)
    Cout_p = _round_up(C_out, LANE)

    # ---- Fold BatchNorm (inference) into conv weights / biases (one-time XLA) ----
    s1 = params["g1"] * jax.lax.rsqrt(params["v1"] + EPS)   # (C_in,)
    s2 = params["g2"] * jax.lax.rsqrt(params["v2"] + EPS)   # (C_out,)
    b1 = params["b1"] - params["m1"] * s1                    # (C_in,)
    b2 = params["b2"] - params["m2"] * s2                    # (C_out,)

    # Conv weights come in PyTorch layout (O, I, K=3).  Fold the BN scale over O,
    # reorder to (K, I, O), zero-pad channels to lane multiples, stack taps on rows.
    def prep_conv(w, scale, o_pad):
        w = w * scale[:, None, None]                         # (O, I, 3)
        w = jnp.transpose(w, (2, 1, 0))                      # (3, I, O)
        w = jnp.pad(w, ((0, 0), (0, Cin_p - w.shape[1]), (0, o_pad - w.shape[2])))
        return w.reshape(3 * Cin_p, o_pad)

    w1f = prep_conv(params["w1"], s1, Cin_p)                 # (3*Cin_p, Cin_p)
    w2f = prep_conv(params["w2"], s2, Cout_p)                # (3*Cin_p, Cout_p)

    # Shortcut Linear: x_nlc @ Wsc^T + bsc.  Stack Wsc^T under conv2's taps so the
    # second matmul also produces the shortcut; fuse its bias with BN2's bias.
    wsc = jnp.pad(jnp.transpose(params["wsc"], (1, 0)),
                  ((0, Cin_p - C_in), (0, Cout_p - C_out)))  # (Cin_p, Cout_p)
    w2sc = jnp.concatenate([w2f, wsc], axis=0)               # (4*Cin_p, Cout_p)

    b1_row = jnp.pad(b1, (0, Cin_p - C_in)).reshape(1, Cin_p).astype(jnp.float32)
    bout_row = (jnp.pad(b2 + params["bsc"], (0, Cout_p - C_out))
                .reshape(1, Cout_p).astype(jnp.float32))

    w1f = w1f.astype(mxu_dtype)      # bf16 MXU inputs on v6e/v7x; f32 path selectable
    w2sc = w2sc.astype(mxu_dtype)

    # ---- Activations: NCL -> (N*L, Cin_p), channels lane-dense ----
    x_nlc = jnp.transpose(x3d, (0, 2, 1))                    # (N, L, C_in)
    x_flat = jnp.pad(x_nlc, ((0, 0), (0, 0), (0, Cin_p - C_in))).reshape(N * L, Cin_p)
    x_flat = x_flat.astype(jnp.float32)

    # Two parallel grid blocks: keeps both v7x TensorCores busy, while single-TC
    # v5e/v6e only pay two (cheap) sequential steps.  Fall back to one block if
    # the batch/row count doesn't split cleanly on the (8,128) tiling.
    if N % 2 == 0 and ((N // 2) * L) % 8 == 0:
        num_blocks = 2
    else:
        num_blocks = 1
    blk_rows = (N // num_blocks) * L

    kernel = functools.partial(_conv_block_kernel, L=L)

    out_flat = pl.pallas_call(
        kernel,
        out_shape=jax.ShapeDtypeStruct((N * L, Cout_p), jnp.float32),
        grid_spec=pltpu.PrefetchScalarGridSpec(
            num_scalar_prefetch=0,
            grid=(num_blocks,),
            in_specs=[
                pl.BlockSpec((blk_rows, Cin_p), lambda i: (i, 0)),       # x
                pl.BlockSpec((3 * Cin_p, Cin_p), lambda i: (0, 0)),      # w1 (BN1 folded)
                pl.BlockSpec((1, Cin_p), lambda i: (0, 0)),              # bias1
                pl.BlockSpec((4 * Cin_p, Cout_p), lambda i: (0, 0)),     # [w2 ; Wsc^T]
                pl.BlockSpec((1, Cout_p), lambda i: (0, 0)),             # fused out bias
            ],
            out_specs=pl.BlockSpec((blk_rows, Cout_p), lambda i: (i, 0)),
        ),
        compiler_params=pltpu.CompilerParams(dimension_semantics=("parallel",)),
    )(x_flat, w1f, b1_row, w2sc, bout_row)

    out = out_flat.reshape(N, L, Cout_p)[:, :, :C_out]        # drop lane padding
    out = jnp.transpose(out, (0, 2, 1))                       # back to (N, C_out, L)
    return out.reshape(lead + (C_out, L))


def reference_forward(x, params):
    """Pure-JAX reference mirroring the PyTorch forward (eval-mode BatchNorm)."""
    lead = x.shape[:-2]
    C_in, L = x.shape[-2], x.shape[-1]
    C_out = params["w2"].shape[0]
    x_ncl = x.reshape((-1, C_in, L))

    def conv1d(a, w):  # a (N,C,L), w (O,C,3), pad=1
        ap = jnp.pad(a, ((0, 0), (0, 0), (1, 1)))
        return sum(jnp.einsum('ncl,oc->nol', ap[:, :, k:k + L], w[:, :, k])
                   for k in range(3))

    def bn(a, g, b, m, v):
        return (a - m[None, :, None]) / jnp.sqrt(v[None, :, None] + EPS) \
            * g[None, :, None] + b[None, :, None]

    h = conv1d(x_ncl, params["w1"])
    h = jnp.maximum(bn(h, params["g1"], params["b1"], params["m1"], params["v1"]), 0.0)
    y = conv1d(h, params["w2"])
    y = bn(y, params["g2"], params["b2"], params["m2"], params["v2"])
    sc = jnp.einsum('ncl,oc->nol', x_ncl, params["wsc"]) + params["bsc"][None, :, None]
    return (y + sc).reshape(lead + (C_out, L))


if __name__ == "__main__":
    # ConvBlockConfig(in_channels=8, out_channel_ratio=2.0, shortcut=True,
    #                 n_conv=2, batch_norm=True)  -> out_channels = 16.
    # Leading dims (2, 2) exercise the module's x.view([-1, C, L]) flattening.
    B1, B2, C_IN, L = 2, 2, 8, 32
    C_OUT = int(C_IN * 2.0)

    key = jax.random.PRNGKey(0)
    ks = jax.random.split(key, 12)

    x = jax.random.normal(ks[0], (B1, B2, C_IN, L), dtype=jnp.float32)

    params = {
        # Conv1d weights: (out_channels, in_channels, kernel_size=3), no bias.
        "w1": 0.2 * jax.random.normal(ks[1], (C_IN, C_IN, 3), dtype=jnp.float32),
        "w2": 0.2 * jax.random.normal(ks[2], (C_OUT, C_IN, 3), dtype=jnp.float32),
        # BatchNorm1d #1 (affine + running stats).
        "g1": 1.0 + 0.1 * jax.random.normal(ks[3], (C_IN,), dtype=jnp.float32),
        "b1": 0.1 * jax.random.normal(ks[4], (C_IN,), dtype=jnp.float32),
        "m1": 0.1 * jax.random.normal(ks[5], (C_IN,), dtype=jnp.float32),
        "v1": 0.5 + jax.random.uniform(ks[6], (C_IN,), dtype=jnp.float32),
        # BatchNorm1d #2.
        "g2": 1.0 + 0.1 * jax.random.normal(ks[7], (C_OUT,), dtype=jnp.float32),
        "b2": 0.1 * jax.random.normal(ks[8], (C_OUT,), dtype=jnp.float32),
        "m2": 0.1 * jax.random.normal(ks[9], (C_OUT,), dtype=jnp.float32),
        "v2": 0.5 + jax.random.uniform(ks[10], (C_OUT,), dtype=jnp.float32),
        # Shortcut Linear(C_in -> C_out): weight (out, in), bias (out,).
        "wsc": 0.2 * jax.random.normal(ks[11], (C_OUT, C_IN), dtype=jnp.float32),
        "bsc": jnp.linspace(-0.1, 0.1, C_OUT, dtype=jnp.float32),
    }

    ref = reference_forward(x, params)

    # f32 MXU path: tight tolerance.
    out_f32 = jax.block_until_ready(conv_block_forward(x, params, mxu_dtype=jnp.float32))
    np.testing.assert_allclose(np.asarray(out_f32), np.asarray(ref), rtol=1e-4, atol=1e-4)

    # bf16 MXU path (default; recommended for v6e/v7x): f32 accumulation, so error
    # is bounded by bf16 input rounding -> looser tolerance.
    out_bf16 = jax.block_until_ready(conv_block_forward(x, params, mxu_dtype=jnp.bfloat16))
    np.testing.assert_allclose(np.asarray(out_bf16), np.asarray(ref), rtol=5e-2, atol=5e-2)

    assert out_bf16.shape == (B1, B2, C_OUT, L)
    print("KERNEL_OK")
</pallas_src>

<mosaic_0001>
module attributes {stable_mosaic.version = 11 : i64} {
  func.func @_conv_block_kernel(%arg0: i32, %arg1: memref<64x128xf32, #tpu.memory_space<vmem>>, %arg2: memref<384x128xf32, #tpu.memory_space<vmem>>, %arg3: memref<1x128xf32, #tpu.memory_space<vmem>>, %arg4: memref<512x128xf32, #tpu.memory_space<vmem>>, %arg5: memref<1x128xf32, #tpu.memory_space<vmem>>, %arg6: memref<64x128xf32, #tpu.memory_space<vmem>>) attributes {dimension_semantics = [#tpu.dimension_semantics<parallel>], iteration_bounds = array<i64: 2>, scalar_prefetch = 0 : i64, scratch_operands = 0 : i64, tpu.core_type = #tpu.core_type<tc>, window_params = [{transform_indices = @transform_0, window_bounds = array<i64: 64, 128>}, {pipeline_mode = #tpu.pipeline_mode<synchronous>, transform_indices = @transform_1, window_bounds = array<i64: 384, 128>}, {pipeline_mode = #tpu.pipeline_mode<synchronous>, transform_indices = @transform_2, window_bounds = array<i64: 1, 128>}, {pipeline_mode = #tpu.pipeline_mode<synchronous>, transform_indices = @transform_3, window_bounds = array<i64: 512, 128>}, {pipeline_mode = #tpu.pipeline_mode<synchronous>, transform_indices = @transform_4, window_bounds = array<i64: 1, 128>}, {transform_indices = @transform_5, window_bounds = array<i64: 64, 128>}]} {
    %c0 = arith.constant 0 : index
    %c0_0 = arith.constant 0 : index
    %0 = vector.load %arg1[%c0, %c0_0] : memref<64x128xf32, #tpu.memory_space<vmem>>, vector<64x128xf32>
    %1 = tpu.iota {dimensions = array<i32: 0>} : vector<64x1xi32>
    %c32_i32 = arith.constant 32 : i32
    %c0_i32 = arith.constant 0 : i32
    %2 = arith.cmpi eq, %c32_i32, %c0_i32 : i32
    %c1_i32 = arith.constant 1 : i32
    %3 = arith.select %2, %c1_i32, %c32_i32 : i32
    %4 = vector.broadcast %3 : i32 to vector<64x1xi32>
    %5 = arith.remsi %1, %4 : vector<64x1xi32>
    %c0_i32_1 = arith.constant 0 : i32
    %6 = vector.broadcast %c0_i32_1 : i32 to vector<64x1xi32>
    %7 = arith.cmpi ne, %5, %6 : vector<64x1xi32>
    %c0_i32_2 = arith.constant 0 : i32
    %8 = vector.broadcast %c0_i32_2 : i32 to vector<64x1xi32>
    %9 = arith.cmpi slt, %5, %8 : vector<64x1xi32>
    %c0_i32_3 = arith.constant 0 : i32
    %10 = arith.cmpi slt, %3, %c0_i32_3 : i32
    %11 = vector.broadcast %10 : i1 to vector<64x1xi1>
    %12 = vector.broadcast %11 : vector<64x1xi1> to vector<64x1xi1>
    %13 = arith.xori %9, %12 : vector<64x1xi1>
    %14 = arith.andi %13, %7 : vector<64x1xi1>
    %15 = vector.broadcast %3 : i32 to vector<64x1xi32>
    %16 = arith.addi %5, %15 : vector<64x1xi32>
    %17 = arith.select %14, %16, %5 : vector<64x1xi1>, vector<64x1xi32>
    %c0_i32_4 = arith.constant 0 : i32
    %18 = vector.broadcast %c0_i32_4 : i32 to vector<64x1xi32>
    %19 = arith.cmpi ne, %17, %18 : vector<64x1xi32>
    %c32_i32_5 = arith.constant 32 : i32
    %c0_i32_6 = arith.constant 0 : i32
    %20 = arith.cmpi eq, %c32_i32_5, %c0_i32_6 : i32
    %c1_i32_7 = arith.constant 1 : i32
    %21 = arith.select %20, %c1_i32_7, %c32_i32_5 : i32
    %22 = vector.broadcast %21 : i32 to vector<64x1xi32>
    %23 = arith.remsi %1, %22 : vector<64x1xi32>
    %c0_i32_8 = arith.constant 0 : i32
    %24 = vector.broadcast %c0_i32_8 : i32 to vector<64x1xi32>
    %25 = arith.cmpi ne, %23, %24 : vector<64x1xi32>
    %c0_i32_9 = arith.constant 0 : i32
    %26 = vector.broadcast %c0_i32_9 : i32 to vector<64x1xi32>
    %27 = arith.cmpi slt, %23, %26 : vector<64x1xi32>
    %c0_i32_10 = arith.constant 0 : i32
    %28 = arith.cmpi slt, %21, %c0_i32_10 : i32
    %29 = vector.broadcast %28 : i1 to vector<64x1xi1>
    %30 = vector.broadcast %29 : vector<64x1xi1> to vector<64x1xi1>
    %31 = arith.xori %27, %30 : vector<64x1xi1>
    %32 = arith.andi %31, %25 : vector<64x1xi1>
    %33 = vector.broadcast %21 : i32 to vector<64x1xi32>
    %34 = arith.addi %23, %33 : vector<64x1xi32>
    %35 = arith.select %32, %34, %23 : vector<64x1xi1>, vector<64x1xi32>
    %c31_i32 = arith.constant 31 : i32
    %36 = vector.broadcast %c31_i32 : i32 to vector<64x1xi32>
    %37 = arith.cmpi ne, %35, %36 : vector<64x1xi32>
    %c1_i32_11 = arith.constant 1 : i32
    %38 = tpu.dynamic_rotate %0 by %c1_i32_11 dim 0 : vector<64x128xf32>, i32 -> vector<64x128xf32>
    %cst = arith.constant 0.000000e+00 : f32
    %39 = vector.shape_cast %19 : vector<64x1xi1> to vector<64x1xi1>
    %40 = vector.broadcast %39 : vector<64x1xi1> to vector<64x128xi1>
    %41 = vector.broadcast %cst : f32 to vector<64x128xf32>
    %42 = arith.select %40, %38, %41 : vector<64x128xi1>, vector<64x128xf32>
    %c63_i32 = arith.constant 63 : i32
    %43 = tpu.dynamic_rotate %0 by %c63_i32 dim 0 : vector<64x128xf32>, i32 -> vector<64x128xf32>
    %cst_12 = arith.constant 0.000000e+00 : f32
    %44 = vector.shape_cast %37 : vector<64x1xi1> to vector<64x1xi1>
    %45 = vector.broadcast %44 : vector<64x1xi1> to vector<64x128xi1>
    %46 = vector.broadcast %cst_12 : f32 to vector<64x128xf32>
    %47 = arith.select %45, %43, %46 : vector<64x128xi1>, vector<64x128xf32>
    %48 = tpu.concatenate %42, %0, %47 in 1 : vector<64x128xf32>, vector<64x128xf32>, vector<64x128xf32> -> vector<64x384xf32>
    %c0_13 = arith.constant 0 : index
    %c0_14 = arith.constant 0 : index
    %49 = vector.load %arg2[%c0_13, %c0_14] : memref<384x128xf32, #tpu.memory_space<vmem>>, vector<384x128xf32>
    %cst_15 = arith.constant dense<0.000000e+00> : vector<64x128xf32>
    %50 = tpu.matmul %48, %49, %cst_15 {dimension_numbers = #tpu.dot_dimension_numbers<[1], [0], [0], [1], [0, 0, 1, 1], [], []>} : vector<64x384xf32>, vector<384x128xf32>, vector<64x128xf32> -> vector<64x128xf32>
    %c0_16 = arith.constant 0 : index
    %c0_17 = arith.constant 0 : index
    %51 = vector.load %arg3[%c0_16, %c0_17] : memref<1x128xf32, #tpu.memory_space<vmem>>, vector<1x128xf32>
    %52 = vector.broadcast %51 : vector<1x128xf32> to vector<64x128xf32>
    %53 = arith.addf %50, %52 : vector<64x128xf32>
    %cst_18 = arith.constant 0.000000e+00 : f32
    %54 = vector.broadcast %cst_18 : f32 to vector<64x128xf32>
    %55 = arith.maximumf %53, %54 : vector<64x128xf32>
    %c1_i32_19 = arith.constant 1 : i32
    %56 = tpu.dynamic_rotate %55 by %c1_i32_19 dim 0 : vector<64x128xf32>, i32 -> vector<64x128xf32>
    %cst_20 = arith.constant 0.000000e+00 : f32
    %57 = vector.shape_cast %19 : vector<64x1xi1> to vector<64x1xi1>
    %58 = vector.broadcast %57 : vector<64x1xi1> to vector<64x128xi1>
    %59 = vector.broadcast %cst_20 : f32 to vector<64x128xf32>
    %60 = arith.select %58, %56, %59 : vector<64x128xi1>, vector<64x128xf32>
    %c63_i32_21 = arith.constant 63 : i32
    %61 = tpu.dynamic_rotate %55 by %c63_i32_21 dim 0 : vector<64x128xf32>, i32 -> vector<64x128xf32>
    %cst_22 = arith.constant 0.000000e+00 : f32
    %62 = vector.shape_cast %37 : vector<64x1xi1> to vector<64x1xi1>
    %63 = vector.broadcast %62 : vector<64x1xi1> to vector<64x128xi1>
    %64 = vector.broadcast %cst_22 : f32 to vector<64x128xf32>
    %65 = arith.select %63, %61, %64 : vector<64x128xi1>, vector<64x128xf32>
    %66 = tpu.concatenate %60, %55, %65, %0 in 1 : vector<64x128xf32>, vector<64x128xf32>, vector<64x128xf32>, vector<64x128xf32> -> vector<64x512xf32>
    %c0_23 = arith.constant 0 : index
    %c0_24 = arith.constant 0 : index
    %67 = vector.load %arg4[%c0_23, %c0_24] : memref<512x128xf32, #tpu.memory_space<vmem>>, vector<512x128xf32>
    %cst_25 = arith.constant dense<0.000000e+00> : vector<64x128xf32>
    %68 = tpu.matmul %66, %67, %cst_25 {dimension_numbers = #tpu.dot_dimension_numbers<[1], [0], [0], [1], [0, 0, 1, 1], [], []>} : vector<64x512xf32>, vector<512x128xf32>, vector<64x128xf32> -> vector<64x128xf32>
    %c0_26 = arith.constant 0 : index
    %c0_27 = arith.constant 0 : index
    %69 = vector.load %arg5[%c0_26, %c0_27] : memref<1x128xf32, #tpu.memory_space<vmem>>, vector<1x128xf32>
    %70 = vector.broadcast %69 : vector<1x128xf32> to vector<64x128xf32>
    %71 = arith.addf %68, %70 : vector<64x128xf32>
    %c0_28 = arith.constant 0 : index
    %c0_29 = arith.constant 0 : index
    %72 = vector.load %arg6[%c0_28, %c0_29] : memref<64x128xf32, #tpu.memory_space<vmem>>, vector<64x128xf32>
    tpu.vector_store %arg6[%c0_28, %c0_29], %71 {strides = array<i32>} : memref<64x128xf32, #tpu.memory_space<vmem>>, vector<64x128xf32>,
    return
  }
  func.func @transform_0(%arg0: i32) -> (i32, i32) {
    %c0_i32 = arith.constant 0 : i32
    %c0_i32_0 = arith.constant 0 : i32
    return %arg0, %c0_i32 : i32, i32
  }
  func.func @transform_1(%arg0: i32) -> (i32, i32) {
    %c0_i32 = arith.constant 0 : i32
    %c0_i32_0 = arith.constant 0 : i32
    %c0_i32_1 = arith.constant 0 : i32
    return %c0_i32, %c0_i32_0 : i32, i32
  }
  func.func @transform_2(%arg0: i32) -> (i32, i32) {
    %c0_i32 = arith.constant 0 : i32
    %c0_i32_0 = arith.constant 0 : i32
    %c0_i32_1 = arith.constant 0 : i32
    return %c0_i32, %c0_i32_0 : i32, i32
  }
  func.func @transform_3(%arg0: i32) -> (i32, i32) {
    %c0_i32 = arith.constant 0 : i32
    %c0_i32_0 = arith.constant 0 : i32
    %c0_i32_1 = arith.constant 0 : i32
    return %c0_i32, %c0_i32_0 : i32, i32
  }
  func.func @transform_4(%arg0: i32) -> (i32, i32) {
    %c0_i32 = arith.constant 0 : i32
    %c0_i32_0 = arith.constant 0 : i32
    %c0_i32_1 = arith.constant 0 : i32
    return %c0_i32, %c0_i32_0 : i32, i32
  }
  func.func @transform_5(%arg0: i32) -> (i32, i32) {
    %c0_i32 = arith.constant 0 : i32
    %c0_i32_0 = arith.constant 0 : i32
    return %arg0, %c0_i32 : i32, i32
  }
}

</mosaic_0001>

<bundles_post_ra>
// kernel: tpu_custom_call.1
= control target key start
LH: loop header
LB: loop body
LE: loop exit
PB: predicated region body
PF: predicated region fallthrough
CT: control target
= control target key end

     0   :  { %10 = vsyncpa [#allocation3], 0  ;;  %s2337_s0 = inlined_call_operand.hbm [shape: f32[128,128], index: 0, kind: input, shape index: {}]   ;;  %s2338_s1 = inlined_call_operand.hbm [shape: f32[384,128], index: 1, kind: input, shape index: {}]   ;;  %s2339_s2 = inlined_call_operand.vmem [shape: f32[1,128], index: 2, kind: input, shape index: {}]   ;;  %s2340_s3 = inlined_call_operand.hbm [shape: f32[512,128], index: 3, kind: input, shape index: {}]   ;;  %s2341_s4 = inlined_call_operand.vmem [shape: f32[1,128], index: 4, kind: input, shape index: {}]   ;;  %s2342_s5 = inlined_call_operand.hbm [shape: f32[128,128], index: 5, kind: output, shape index: {}]  }
   0x1   :  { %12 = vsyncpa [#allocation3 + $0x1], 0 }
   0x2   :  { %13 = vsyncpa [#allocation6], 0 }
   0x3   :  { %14 = vsyncpa [#allocation4], 0 }
   0x4   :  { %16 = vsyncpa [#allocation4 + $0x1], 0  ;;  %s1862_s18 = smov 0   ;;  %s1864_s19 = smov 0  }
   0x5   :  { %s1866_s20 = smov 0   ;;  %s1868_s21 = smov 0  }
   0x6 LB: > { %s1883_s22 = sadd.s32 4294967295, %s1822_s21   ;;  %s1201_s23 = sadd.s32 4294967294, %s1822_s21   ;;  %s1822_s21 = sphi %s1868_s21, %s2370_s21   ;;  %s1818_s20 = sphi %s1866_s20, %s2369_s20   ;;  %s1814_s19 = sphi %s1864_s19, %s2368_s19   ;;  %s1810_s18 = sphi %s1862_s18, %s2367_s18  }
   0x7   : > { %p42_p0 = scmp.ne.s32.totalorder %s1814_s19, %s1810_s18  ;;  %p2343_p1 = scmp.eq.s32.totalorder %s1883_s22, 0 }
   0x8   : > { %p156_p3 = scmp.eq.s32.totalorder %s1201_s23, 1  ;;  %p1202_p5 = scmp.ge.s32.totalorder %s1822_s21, 1 }
   0x9   : > { %p1892_p4 = por %p2343_p1, %p42_p0  ;;  %p163_p7 = scmp.lt.s32.totalorder %s1822_s21, 3 }
   0xa   : > { %p1897_p6 = por %p156_p3, %p42_p0  ;;  %s1824_s27 = smov [#allocation5]  }
   0xb   : > { %s2346_s24 = scalar_select %p1892_p4, 1, 0 }
   0xc   : > { %s2347_s25 = scalar_select %p1897_p6, 1, 0 }
   0xd   : > { %p1902_p8 = pnand %p1202_p5, %p163_p7  ;;  %s175_s28 = sshll.u32 %s1824_s27, 4  ;;  %s1906_s28 = int_to_ptr.vmem [resolvable:$true] %s175_s28 }
   0xe   : > { %s1825_s30 = smov [#allocation7]   ;;  %s1666_s9 = scalar_lea.hbm %s2338_s1, 6144 }
   0xf   : > { %p1607_p9 = pneg %p1902_p8  ;;  %s191_s6 = sshll.u32 %s1825_s30, 4  ;;  %s1917_s6 = int_to_ptr.vmem [resolvable:$true] %s191_s6 }
  0x10   : > { %p1667_p12 = scmp.ne.s32.totalorder %s2338_s1, %s1666_s9  ;;  %p1673_p5 = scmp.lt.u32.totalorder %s1666_s9, %s2338_s1 }
  0x11   : > { %p1913_p11 = pnand %p1607_p9, %p2343_p1 }
  0x13   : > { %p1668_p13 = pneg %p1913_p11 }
  0x15   : > { %p1669_p0 = pnand %p1668_p13, %p1667_p12 }
  0x17   : > { %p1670_p3 = pneg %p1669_p0 }
  0x19   : > { %p1675_p7 = pnand %p1673_p5, %p1670_p3 }
  0x1b   : > { %1678 = shalt.err (!%p1675_p7)
}
  0x1c   : > { %s1679_s14 = scalar_lea.vmem %s1906_s28, 6144  ;;  %p1687_p2 = scmp.lt.s32.totalorder %s1906_s28, %s1906_s28 }
  0x1d   : > { %p1680_p9 = scmp.ne.s32.totalorder %s1906_s28, %s1679_s14  ;;  %p1688_p12 = scmp.lt.s32.totalorder %s1679_s14, %s1679_s14 }
  0x1f   : > { %p1682_p10 = pnand %p1680_p9, %p1668_p13  ;;  %p1689_p0 = por %p1688_p12, %p1687_p2 }
  0x21   : > { %p1683_p1 = pneg %p1682_p10 }
  0x23   : > { %p1690_p6 = pnand %p1689_p0, %p1683_p1 }
  0x25   : > { %1693 = shalt.err (!%p1690_p6)
}
  0x26   : > { %s1826_s15 = smov 128   ;;  %s1827_s16 = smov 8  }
  0x27   : > { %1610 = dma.hbm_to_vmem [thread:$0]  (!%p1913_p11), %s2338_s1, 6144, %s1906_s28, [#allocation6], %s1826_s15, %s1826_s15, %s1827_s16  }
  0x28   : > { %s1694_s7 = scalar_lea.hbm %s2340_s3, 8192 }
  0x29   : > { %p1695_p1 = scmp.ne.s32.totalorder %s2340_s3, %s1694_s7  ;;  %p1701_p10 = scmp.lt.u32.totalorder %s1694_s7, %s2340_s3 }
  0x2b   : > { %p1697_p2 = pnand %p1695_p1, %p1668_p13 }
  0x2d   : > { %p1698_p6 = pneg %p1697_p2 }
  0x2f   : > { %p1703_p3 = pnand %p1701_p10, %p1698_p6 }
  0x31   : > { %1706 = shalt.err (!%p1703_p3)
}
  0x32   : > { %s1707_s28 = scalar_lea.vmem %s1917_s6, 8192  ;;  %p1715_p12 = scmp.lt.s32.totalorder %s1917_s6, %s1917_s6 }
  0x33   : > { %p1708_p5 = scmp.ne.s32.totalorder %s1917_s6, %s1707_s28  ;;  %p1716_p0 = scmp.lt.s32.totalorder %s1707_s28, %s1707_s28 }
  0x35   : > { %p1710_p7 = pnand %p1708_p5, %p1668_p13  ;;  %p1717_p1 = por %p1716_p0, %p1715_p12 }
  0x37   : > { %p1711_p9 = pneg %p1710_p7 }
  0x39   : > { %p1718_p2 = pnand %p1717_p1, %p1711_p9 }
  0x3b   : > { %1721 = shalt.err (!%p1718_p2)
}
  0x3c   : > { %1613 = dma.hbm_to_vmem [thread:$0]  (!%p1913_p11), %s2340_s3, 8192, %s1917_s6, [#allocation6], %s1826_s15, %s1826_s15, %s1827_s16  }
  0x3d   : > { %s1978_s29 = sadd.s32 1, %s1822_s21   ;;  %s29_s14 = sadd.s32 1, %s1818_s20 }
  0x3e   : > { %s26_s17 = ssub.s32 %s1822_s21, %s1978_s29  ;;  %p36_p13 = scmp.ne.s32.totalorder %s1818_s20, %s1814_s19 }
  0x3f   : > { %p27_p6 = scmp.eq.s32.totalorder %s26_s17, 0  ;;  %p37_p10 = scmp.eq.s32.totalorder %s1822_s21, 0 }
  0x40   : > { %p2350_p3 = scmp.eq.s32.totalorder %s1883_s22, 1  ;;  %p1624_p7 = scmp.lt.s32.totalorder %s1822_s21, 2 }
  0x41   : > { %s1994_s27 = scalar_select %p27_p6, %s1818_s20, %s29_s14  }
  0x42   : > { %p1988_p5 = por %p2350_p3, %p36_p13  ;;  %p38_p9 = por %p37_p10, %p36_p13 }
  0x43   : > { %s208_s30 = sand.u32 1, %s1818_s20   ;;  %s1229_s6 = sshll.u32 %s1822_s21, 10 }
  0x44   : > { %s2351_s23 = scalar_select %p1988_p5, 1, 0 }
  0x45   : > { %s1206_s7 = sshll.u32 %s208_s30, 6  ;;  %s2001_s10 = scalar_lea.hbm %s2337_s0, %s1229_s6 }
  0x46   : > { %s212_s11 = scalar_lea.vmem [#allocation2], %s1206_s7  ;;  %p2005_p11 = pnand %p1624_p7, %p38_p9 }
  0x47   : > { %s219_s28 = sshll.u32 %s212_s11, 4  ;;  %s2009_s13 = scalar_lea.sflag [#allocation3], %s208_s30  ;;  %s2003_s28 = int_to_ptr.vmem [resolvable:$true] %s219_s28 }
  0x48   : > { %s1722_s14 = scalar_lea.hbm %s2001_s10, 1024  ;;  %p1724_p0 = pneg %p2005_p11 }
  0x49   : > { %p1723_p12 = scmp.ne.s32.totalorder %s2001_s10, %s1722_s14  ;;  %s1727_s6 = scalar_lea.hbm %s2337_s0, 2048 }
  0x4a   : > { %p1728_p13 = scmp.lt.u32.totalorder %s2001_s10, %s2337_s0  ;;  %p1729_p6 = scmp.lt.u32.totalorder %s1727_s6, %s1722_s14 }
  0x4b   : > { %p1725_p1 = pnand %p1724_p0, %p1723_p12  ;;  %p1731_p3 = scmp.lt.u32.totalorder %s1722_s14, %s2001_s10 }
  0x4c   : > { %p1730_p10 = por %p1729_p6, %p1728_p13 }
  0x4d   : > { %p1726_p2 = pneg %p1725_p1 }
  0x4e   : > { %p1732_p7 = por %p1731_p3, %p1730_p10 }
  0x50   : > { %p1733_p9 = pnand %p1732_p7, %p1726_p2 }
  0x52   : > { %1736 = shalt.err (!%p1733_p9)
}
  0x53   : > { %s1737_s30 = scalar_lea.vmem %s2003_s28, 1024  ;;  %s1828_s11 = smov [#allocation2]  }
  0x54   : > { %p1738_p12 = scmp.ne.s32.totalorder %s2003_s28, %s1737_s30  ;;  %s1742_s17 = sshll.u32 %s1828_s11, 4  ;;  %s1743_s17 = int_to_ptr.vmem [resolvable:$false] %s1742_s17 }
  0x55   : > { %s1744_s7 = scalar_lea.vmem %s1743_s17, 2048  ;;  %p1745_p4 = scmp.lt.s32.totalorder %s2003_s28, %s1743_s17 }
  0x56   : > { %p1740_p1 = pnand %p1738_p12, %p1724_p0  ;;  %p1746_p13 = scmp.lt.s32.totalorder %s1744_s7, %s1737_s30 }
  0x58   : > { %p1741_p5 = pneg %p1740_p1  ;;  %p1747_p6 = por %p1746_p13, %p1745_p4 }
  0x5a   : > { %p1748_p10 = pnand %p1747_p6, %p1741_p5 }
  0x5c   : > { %1751 = shalt.err (!%p1748_p10)
}
  0x5d   : > { %1617 = dma.hbm_to_vmem [thread:$0]  (!%p2005_p11), %s2001_s10, 1024, %s2003_s28, %s2009_s13, %s1826_s15, %s1826_s15, %s1827_s16  }
  0x5e   : > { %231 = sbr.rel (%p1902_p8) target bundleno = 654 (0x28e), region = 40  ;;  %s2043_s14 = sand.u32 (!%p1902_p8), 1, %s1814_s19  }
  0x5f   : > { %s1210_s6 = sshll.u32 (!%p1902_p8), %s2043_s14, 6  ;;  %s234_s8 = scalar_lea.sflag (!%p1902_p8), [#allocation3], %s2043_s14 }
  0x60   : > { %s2049_s12 = scalar_lea.vmem (!%p1902_p8), [#allocation2], %s1210_s6  ;;  %p2353_p4 = scmp.ne.s32.totalorder (!%p1902_p8), %s2346_s24, 0 }
  0x65   : > { %1797 = dma.done.wait (%p2353_p4), %s234_s8, 1024  }
  0x66   : > { %1799 = vsyncadd (%p2353_p4), %s234_s8, 4294966272  ;;  %p2354_p5 = scmp.eq.s32.totalorder %s1883_s22, 0 }
  0x68   : > { %1801 = dma.done.wait (%p2354_p5), [#allocation6], 14336   ;;  %p2355_p8 = pmov %p2354_p5 }
  0x69   : > { %v501_v0 = vld [vmem:[#allocation5 + $0x80] sm:$0xff]  ;;  %v502_v1 = vld [vmem:[#allocation5 + $0x88] sm:$0xff]  ;;  %v503_v5 = vld [vmem:[#allocation5 + $0x90] sm:$0xff]  ;;  %v282_v36 = vlaneseq  ;;  %s2276_s10 = scalar_lea.vmem [#allocation8], %s1210_s6  ;;  %s1230_s28 = sshll.u32 %s1883_s22, 10 }
  0x6a   : > { %1803 = vsyncadd (%p2355_p8), [#allocation6], 4294952960  ;;  %v485_v2 = vld [vmem:[#allocation5] sm:$0xff]  ;;  %v1467_v3 = vpack.c.bf16 %v502_v1, %v501_v0  ;;  %v486_v4 = vld [vmem:[#allocation5 + $0x8] sm:$0xff]  ;;  %s1109_s13 = sshll.u32 %s2276_s10, 4  ;;  %s2290_s11 = scalar_lea.hbm %s2342_s5, %s1230_s28  ;;  %s2292_s13 = int_to_ptr.vmem [resolvable:$true] %s1109_s13 }
  0x6b   : > { %v504_v6 = vld [vmem:[#allocation5 + $0x98] sm:$0xff]  ;;  %v1469_v7 = vpack.c.bf16 %v486_v4, %v485_v2  ;;  %v517_v9 = vld [vmem:[#allocation5 + $0x100] sm:$0xff]  ;;  %v518_v10 = vld [vmem:[#allocation5 + $0x108] sm:$0xff]  ;;  %v2059_v46 = vshrl.u32 %v282_v36, 7  ;;  %s1096_s17 = scalar_lea.sflag [#allocation4], %s2043_s14  ;;  %s1752_s7 = scalar_lea.vmem %s2292_s13, 1024 }
  0x6c   : > { %v1471_v8 = vpack.c.bf16 %v504_v6, %v503_v5  ;;  %v487_v11 = vld [vmem:[#allocation5 + $0x10] sm:$0xff]  ;;  %1468 = vmatprep.subr.bf16.mxu0 %v1467_v3  ;;  %v1499_v12 = vpack.c.bf16 %v518_v10, %v517_v9  ;;  %v488_v13 = vld [vmem:[#allocation5 + $0x18] sm:$0xff]  ;;  %v505_v14 = vld [vmem:[#allocation5 + $0xa0] sm:$0xff]  ;;  %p1753_p11 = scmp.ne.s32.totalorder %s2292_s13, %s1752_s7  ;;  %p2364_p0 = scmp.ne.s32.totalorder %s2351_s23, 0 }
  0x6d   : > { %v506_v15 = vld [vmem:[#allocation5 + $0xa8] sm:$0xff]  ;;  %1470 = vmatpush3.bf16.msra.mxu0 %v1469_v7  ;;  %v1473_v16 = vpack.c.bf16 %v488_v13, %v487_v11  ;;  %v519_v17 = vld [vmem:[#allocation5 + $0x110] sm:$0xff]  ;;  %v520_v18 = vld [vmem:[#allocation5 + $0x118] sm:$0xff]  ;;  %vm452_vm0 = vcmp.lt.s32.totalorder %v2059_v46, 7  ;;  %vm411_vm1 = vcmp.lt.s32.totalorder %v2059_v46, 1  ;;  %s1829_s22 = smov [#allocation8]  }
  0x6e   : > { %1472 = vmatprep.subr.bf16.mxu0 %v1471_v8  ;;  %1500 = vmatprep.subr.bf16.mxu1 %v1499_v12  ;;  %v1475_v19 = vpack.c.bf16 %v506_v15, %v505_v14  ;;  %v1503_v20 = vpack.c.bf16 %v520_v18, %v519_v17  ;;  %v489_v21 = vld [vmem:[#allocation5 + $0x20] sm:$0xff]  ;;  %v490_v22 = vld [vmem:[#allocation5 + $0x28] sm:$0xff]  ;;  %v507_v23 = vld [vmem:[#allocation5 + $0xb0] sm:$0xff]  ;;  %v295_v18 = vand.u32 31, %v2059_v46  ;;  %p1754_p2 = pnand %p1753_p11, %p2364_p0  ;;  %s1756_s6 = sshll.u32 %s1829_s22, 4  ;;  %s1757_s6 = int_to_ptr.vmem [resolvable:$false] %s1756_s6 }
  0x6f   : > { %1502 = vmatpush3.bf16.msra.mxu1 %v1499_v12  ;;  %v508_v24 = vld [vmem:[#allocation5 + $0xb8] sm:$0xff]  ;;  %v521_v25 = vld [vmem:[#allocation5 + $0x120] sm:$0xff]  ;;  %v522_v26 = vld [vmem:[#allocation5 + $0x128] sm:$0xff]  ;;  %v1477_v28 = vpack.c.bf16 %v490_v22, %v489_v21  ;;  %s1758_s8 = scalar_lea.vmem %s1757_s6, 2048  ;;  %p1759_p7 = scmp.lt.s32.totalorder %s2292_s13, %s1757_s6 }
  0x70   : > { %1504 = vmatprep.subr.bf16.mxu1 %v1503_v20  ;;  %v1507_v27 = vpack.c.bf16 %v522_v26, %v521_v25  ;;  %v523_v29 = vld [vmem:[#allocation5 + $0x130] sm:$0xff]  ;;  %v524_v30 = vld [vmem:[#allocation5 + $0x138] sm:$0xff]  ;;  %v1479_v31 = vpack.c.bf16 %v508_v24, %v507_v23  ;;  %v509_v34 = vld [vmem:[#allocation5 + $0xc0] sm:$0xff]  ;;  %v286_v24 = vadd.s32 24, %v2059_v46  ;;  %vm2094_vm2 = vcmp.ne.s32.totalorder %v295_v18, 0  ;;  %p1755_p3 = pneg %p1754_p2  ;;  %p1760_p9 = scmp.lt.s32.totalorder %s1758_s8, %s1752_s7 }
  0x71   : > { %1474 = vmatpush3.bf16.msra.mxu0 %v1473_v16  ;;  %v491_v32 = vld [vmem:[#allocation5 + $0x30] sm:$0xff]  ;;  %v492_v33 = vld [vmem:[#allocation5 + $0x38] sm:$0xff]  ;;  %v510_v35 = vld [vmem:[#allocation5 + $0xc8] sm:$0xff]  ;;  %v1511_v37 = vpack.c.bf16 %v524_v30, %v523_v29 }
  0x72   : > { %1476 = vmatprep.subr.bf16.mxu0 %v1475_v19  ;;  %v1481_v38 = vpack.c.bf16 %v492_v33, %v491_v32  ;;  %v525_v39 = vld [vmem:[#allocation5 + $0x140] sm:$0xff]  ;;  %v526_v40 = vld [vmem:[#allocation5 + $0x148] sm:$0xff]  ;;  %v1483_v41 = vpack.c.bf16 %v510_v35, %v509_v34  ;;  %v511_v44 = vld [vmem:[#allocation5 + $0xd0] sm:$0xff]  ;;  %p1761_p12 = por %p1760_p9, %p1759_p7 }
  0x73   : > { %1506 = vmatpush3.bf16.msra.mxu1 %v1503_v20  ;;  %v493_v42 = vld [vmem:[#allocation5 + $0x40] sm:$0xff]  ;;  %v494_v43 = vld [vmem:[#allocation5 + $0x48] sm:$0xff]  ;;  %v512_v45 = vld [vmem:[#allocation5 + $0xd8] sm:$0xff]  ;;  %v1515_v47 = vpack.c.bf16 %v526_v40, %v525_v39 }
  0x74   : > { %1508 = vmatprep.subr.bf16.mxu1 %v1507_v27  ;;  %v2062_v48 = vld [vmem:[%s2049_s12] sm:$0xff]  ;;  %v1485_v49 = vpack.c.bf16 %v494_v43, %v493_v42  ;;  %v527_v50 = vld [vmem:[#allocation5 + $0x150] sm:$0xff]  ;;  %v528_v51 = vld [vmem:[#allocation5 + $0x158] sm:$0xff]  ;;  %v1487_v54 = vpack.c.bf16 %v512_v45, %v511_v44  ;;  %p1762_p1 = pnand %p1761_p12, %p1755_p3 }
  0x75   : > { %1478 = vmatpush3.bf16.msra.mxu0 %v1477_v28  ;;  %604 = vmatprep.mubr.f32.mxu0 %v2062_v48  ;;  %v2067_v52 = vld [vmem:[%s2049_s12 + $0x8] sm:$0xff]  ;;  %v444_v53 = vrot.slane %v2062_v48, 1  ;;  %v495_v55 = vld [vmem:[#allocation5 + $0x50] sm:$0xff]  ;;  %v496_v56 = vld [vmem:[#allocation5 + $0x58] sm:$0xff]  ;;  %v1519_v60 = vpack.c.bf16 %v528_v51, %v527_v50  ;;  %v403_v17 = vrot.slane %v2062_v48, 7 }
  0x76   : > { %1480 = vmatprep.subr.bf16.mxu0 %v1479_v31  ;;  %v445_v57 = vrot.slane %v2067_v52, 1  ;;  %v513_v58 = vld [vmem:[#allocation5 + $0xe0] sm:$0xff]  ;;  %v514_v59 = vld [vmem:[#allocation5 + $0xe8] sm:$0xff]  ;;  %v1489_v62 = vpack.c.bf16 %v496_v56, %v495_v55  ;;  %v515_v4 = vld [vmem:[#allocation5 + $0xf0] sm:$0xff]  ;;  %v404_v32 = vrot.slane %v2067_v52, 7 }
  0x77   : > { %1510 = vmatpush3.bf16.msra.mxu1 %v1507_v27  ;;  %v529_v63 = vld [vmem:[#allocation5 + $0x160] sm:$0xff]  ;;  %v530_v0 = vld [vmem:[#allocation5 + $0x168] sm:$0xff]  ;;  %v1491_v1 = vpack.c.bf16 %v514_v59, %v513_v58  ;;  %v516_v5 = vld [vmem:[#allocation5 + $0xf8] sm:$0xff] }
  0x78   : > { %1512 = vmatprep.subr.bf16.mxu1 %v1511_v37  ;;  %v459_v61 = vsel %vm452_vm0, %v444_v53, %v445_v57  ;;  %v497_v2 = vld [vmem:[#allocation5 + $0x60] sm:$0xff]  ;;  %v498_v3 = vld [vmem:[#allocation5 + $0x68] sm:$0xff]  ;;  %v1523_v6 = vpack.c.bf16 %v530_v0, %v529_v63  ;;  %v531_v8 = vld [vmem:[#allocation5 + $0x170] sm:$0xff]  ;;  %v1495_v10 = vpack.c.bf16 %v516_v5, %v515_v4 }
  0x79   : > { %1482 = vmatpush3.bf16.msra.mxu0 %v1481_v38  ;;  %1455 = vmatprep.mubr.f32.mxu1 %v459_v61  ;;  %v1493_v7 = vpack.c.bf16 %v498_v3, %v497_v2  ;;  %v532_v9 = vld [vmem:[#allocation5 + $0x178] sm:$0xff]  ;;  %v499_v11 = vld [vmem:[#allocation5 + $0x70] sm:$0xff]  ;;  %v854_v21 = vld [vmem:[#allocation7 + $0x180] sm:$0xff]  ;;  %v287_v2 = vadd.s32 32, %v2059_v46 }
  0x7a   : > { %1484 = vmatprep.subr.bf16.mxu0 %v1483_v41  ;;  %v500_v12 = vld [vmem:[#allocation5 + $0x78] sm:$0xff]  ;;  %v1527_v14 = vpack.c.bf16 %v532_v9, %v531_v8  ;;  %v2079_v15 = vld [vmem:[%s2049_s12 + $0x10] sm:$0xff]  ;;  %v855_v22 = vld [vmem:[#allocation7 + $0x188] sm:$0xff] }
  0x7b   : > { %1514 = vmatpush3.bf16.msra.mxu1 %v1511_v37  ;;  %v2076_v13 = vld [vmem:[%s2049_s12 + $0x38] sm:$0xff]  ;;  %v1497_v16 = vpack.c.bf16 %v500_v12, %v499_v11  ;;  %v446_v23 = vrot.slane %v2079_v15, 1  ;;  %v2092_v26 = vld [vmem:[%s2049_s12 + $0x20] sm:$0xff]  ;;  %v1563_v27 = vpack.c.bf16 %v855_v22, %v854_v21  ;;  %v839_v29 = vld [vmem:[#allocation7 + $0x108] sm:$0xff]  ;;  %v316_v37 = vand.u32 31, %v286_v24 }
  0x7c   : > { %1516 = vmatprep.subr.bf16.mxu1 %v1515_v47  ;;  %v410_v19 = vrot.slane %v2076_v13, 7  ;;  %v2085_v20 = vld [vmem:[%s2049_s12 + $0x18] sm:$0xff]  ;;  %v838_v28 = vld [vmem:[#allocation7 + $0x100] sm:$0xff]  ;;  %v2104_v33 = vld [vmem:[%s2049_s12 + $0x28] sm:$0xff]  ;;  %v448_v38 = vrot.slane %v2092_v26, 1 }
  0x7d   : > { %1486 = vmatpush3.bf16.msra.mxu0 %v1485_v49  ;;  %v447_v25 = vrot.slane %v2085_v20, 1  ;;  %v856_v34 = vld [vmem:[#allocation7 + $0x190] sm:$0xff]  ;;  %v857_v35 = vld [vmem:[#allocation7 + $0x198] sm:$0xff]  ;;  %v458_v36 = vsel %vm452_vm0, %v445_v57, %v446_v23  ;;  %v1565_v39 = vpack.c.bf16 %v839_v29, %v838_v28  ;;  %v449_v41 = vrot.slane %v2104_v33, 1  ;;  %v858_v50 = vld [vmem:[#allocation7 + $0x1a0] sm:$0xff] }
  0x7e   : > { %1488 = vmatprep.subr.bf16.mxu0 %v1487_v54  ;;  %v419_v31 = vsel %vm411_vm1, %v410_v19, %v403_v17  ;;  %v2115_v42 = vld [vmem:[%s2049_s12 + $0x30] sm:$0xff]  ;;  %v1567_v43 = vpack.c.bf16 %v857_v35, %v856_v34  ;;  %v841_v45 = vld [vmem:[#allocation7 + $0x118] sm:$0xff]  ;;  %v405_v49 = vrot.slane %v2079_v15, 7  ;;  %v859_v51 = vld [vmem:[#allocation7 + $0x1a8] sm:$0xff]  ;;  %v290_v54 = vadd.s32 56, %v2059_v46 }
  0x7f   : > { %1518 = vmatpush3.bf16.msra.mxu1 %v1515_v47  ;;  %v457_v40 = vsel %vm452_vm0, %v446_v23, %v447_v25  ;;  %v840_v44 = vld [vmem:[#allocation7 + $0x110] sm:$0xff]  ;;  %v418_v47 = vsel %vm411_vm1, %v403_v17, %v404_v32  ;;  %vm2122_vm3 = vcmp.ne.s32.totalorder %v316_v37, 31  ;;  %v456_v56 = vsel %vm452_vm0, %v447_v25, %v448_v38  ;;  %v843_v63 = vld [vmem:[#allocation7 + $0x128] sm:$0xff]  ;;  %v861_v4 = vld [vmem:[#allocation7 + $0x1b8] sm:$0xff] }
  0x80   : > { %1520 = vmatprep.subr.bf16.mxu1 %v1519_v60  ;;  %v450_v57 = vrot.slane %v2115_v42, 1  ;;  %v1569_v58 = vpack.c.bf16 %v841_v45, %v840_v44  ;;  %v455_v59 = vsel %vm452_vm0, %v448_v38, %v449_v41  ;;  %v1571_v61 = vpack.c.bf16 %v859_v51, %v858_v50  ;;  %v860_v3 = vld [vmem:[#allocation7 + $0x1b0] sm:$0xff]  ;;  %v845_v11 = vld [vmem:[#allocation7 + $0x138] sm:$0xff]  ;;  %v862_v28 = vld [vmem:[#allocation7 + $0x1c0] sm:$0xff] }
  0x81   : > { %1490 = vmatpush3.bf16.msra.mxu0 %v1489_v62  ;;  %v842_v62 = vld [vmem:[#allocation7 + $0x120] sm:$0xff]  ;;  %v417_v0 = vsel %vm411_vm1, %v404_v32, %v405_v49  ;;  %v1575_v9 = vpack.c.bf16 %v861_v4, %v860_v3  ;;  %v408_v24 = vrot.slane %v2104_v33, 7  ;;  %v409_v25 = vrot.slane %v2115_v42, 7  ;;  %v863_v29 = vld [vmem:[#allocation7 + $0x1c8] sm:$0xff]  ;;  %v865_v37 = vld [vmem:[#allocation7 + $0x1d8] sm:$0xff] }
  0x82   : > { %1492 = vmatprep.subr.bf16.mxu0 %v1491_v1  ;;  %v406_v1 = vrot.slane %v2085_v20, 7  ;;  %v454_v5 = vsel %vm452_vm0, %v449_v41, %v450_v57  ;;  %v846_v32 = vld [vmem:[#allocation7 + $0x140] sm:$0xff]  ;;  %v847_v34 = vld [vmem:[#allocation7 + $0x148] sm:$0xff]  ;;  %v852_v4 = vld [vmem:[#allocation7 + $0x170] sm:$0xff] }
  0x83   : > { %1522 = vmatpush3.bf16.msra.mxu1 %v1519_v60  ;;  %v451_v60 = vrot.slane %v2076_v13, 1  ;;  %v1581_v35 = vpack.c.bf16 %v847_v34, %v846_v32  ;;  %v823_v44 = vld [vmem:[#allocation7 + $0x88] sm:$0xff]  ;;  %v833_v32 = vld [vmem:[#allocation7 + $0xd8] sm:$0xff] }
  0x84   : > { %1524 = vmatprep.subr.bf16.mxu1 %v1523_v6  ;;  %v416_v12 = vsel %vm411_vm1, %v405_v49, %v406_v1  ;;  %v807_v49 = vld [vmem:[#allocation7 + $0x8] sm:$0xff] }
  0x85   : > { %1494 = vmatpush3.bf16.msra.mxu0 %v1493_v7  ;;  %v1573_v7 = vpack.c.bf16 %v843_v63, %v842_v62  ;;  %v453_v8 = vsel %vm452_vm0, %v450_v57, %v451_v60  ;;  %v460_v18 = vsel %vm452_vm0, %v451_v60, %v444_v53  ;;  %v867_v50 = vld [vmem:[#allocation7 + $0x1e8] sm:$0xff]  ;;  %v825_v60 = vld [vmem:[#allocation7 + $0x98] sm:$0xff]  ;;  %v808_v63 = vld [vmem:[#allocation7 + $0x10] sm:$0xff] }
  0x86   : > { %1496 = vmatprep.subr.bf16.mxu0 %v1495_v10  ;;  %v844_v10 = vld [vmem:[#allocation7 + $0x130] sm:$0xff]  ;;  %v851_v57 = vld [vmem:[#allocation7 + $0x168] sm:$0xff] }
  0x87   : > { %1526 = vmatpush3.bf16.msra.mxu1 %v1523_v6  ;;  %v344_v6 = vand.u32 31, %v290_v54  ;;  %v1577_v21 = vpack.c.bf16 %v845_v11, %v844_v10  ;;  %v810_v10 = vld [vmem:[#allocation7 + $0x20] sm:$0xff]  ;;  %v811_v11 = vld [vmem:[#allocation7 + $0x28] sm:$0xff] }
  0x88   : > { %1528 = vmatprep.subr.bf16.mxu1 %v1527_v14 }
  0x89   : > { %1498 = vmatpush3.bf16.msra.mxu0 %v1497_v16  ;;  %v407_v16 = vrot.slane %v2092_v26, 7  ;;  %vm2147_vm4 = vcmp.ne.s32.totalorder %v344_v6, 31 }
  0x8b   : > { %1530 = vmatpush3.bf16.msra.mxu1 %v1527_v14  ;;  %v323_v14 = vand.u32 31, %v287_v2  ;;  %v415_v23 = vsel %vm411_vm1, %v406_v1, %v407_v16  ;;  %v414_v53 = vsel %vm411_vm1, %v407_v16, %v408_v24  ;;  %v869_v1 = vld [vmem:[#allocation7 + $0x1f8] sm:$0xff] }
  0x8c   : > { %1215 = vmatmul.mubr.msk.f32.vlgmr.msra.gmra.mrb[0].mxu0 %vm2094_vm2, %v419_v31  ;;  %1564 = vmatprep.subr.bf16.mxu1 %v1563_v27  ;;  %v413_v27 = vsel %vm411_vm1, %v408_v24, %v409_v25  ;;  %v1579_v31 = vpack.c.bf16 %v863_v29, %v862_v28  ;;  %v829_v16 = vld [vmem:[#allocation7 + $0xb8] sm:$0xff]  ;;  %v815_v28 = vld [vmem:[#allocation7 + $0x48] sm:$0xff] }
  0x8d   : > { %609 = vmatprep.mubr.f32.mxu0 %v2067_v52  ;;  %vm2156_vm5 = vcmp.ne.s32.totalorder %v323_v14, 0  ;;  %v828_v14 = vld [vmem:[#allocation7 + $0xb0] sm:$0xff] }
  0x8e   : > { %1456 = vmatmul.mubr.f32.vlgmr.msra.gmra.mrb[0].mxu1 %v458_v36  ;;  %v864_v36 = vld [vmem:[#allocation7 + $0x1d0] sm:$0xff] }
  0x8f   : > { %1458 = vmatprep.mubr.f32.mxu1 %v457_v40  ;;  %1566 = vmatpush3.bf16.msra.mxu1 %v1565_v39  ;;  %v1583_v38 = vpack.c.bf16 %v865_v37, %v864_v36  ;;  %v848_v39 = vld [vmem:[#allocation7 + $0x150] sm:$0xff]  ;;  %v849_v40 = vld [vmem:[#allocation7 + $0x158] sm:$0xff] }
  0x90   : > { %610 = vmatmul.mubr.f32.gmra.mrb[2].mxu0 %v418_v47  ;;  %1568 = vmatprep.subr.bf16.mxu1 %v1567_v43  ;;  %v1585_v41 = vpack.c.bf16 %v849_v40, %v848_v39  ;;  %v822_v43 = vld [vmem:[#allocation7 + $0x80] sm:$0xff]  ;;  %v817_v36 = vld [vmem:[#allocation7 + $0x58] sm:$0xff]  ;;  %v835_v39 = vld [vmem:[#allocation7 + $0xe8] sm:$0xff] }
  0x91   : > { %614 = vmatprep.mubr.f32.mxu0 %v2079_v15  ;;  %v1531_v45 = vpack.c.bf16 %v823_v44, %v822_v43  ;;  %v806_v47 = vld [vmem:[#allocation7] sm:$0xff]  ;;  %v819_v43 = vld [vmem:[#allocation7 + $0x68] sm:$0xff] }
  0x92   : > { %1459 = vmatmul.mubr.msk.f32.gmra.mrb[2].mxu1 %vm2122_vm3, %v456_v56  ;;  %v1533_v51 = vpack.c.bf16 %v807_v49, %v806_v47  ;;  %v850_v56 = vld [vmem:[#allocation7 + $0x160] sm:$0xff]  ;;  %v820_v49 = vld [vmem:[#allocation7 + $0x70] sm:$0xff] }
  0x93   : > { %1461 = vmatprep.mubr.f32.mxu1 %v455_v59  ;;  %1570 = vmatpush3.bf16.msra.mxu1 %v1569_v58  ;;  %v1589_v58 = vpack.c.bf16 %v851_v57, %v850_v56  ;;  %v824_v59 = vld [vmem:[#allocation7 + $0x90] sm:$0xff]  ;;  %v2183_v57 = vld [vmem:[%s2339_s2] ss:$0 sm:$0xff] }
  0x94   : > { %615 = vmatmul.mubr.f32.gmra.mrb[4].mxu0 %v417_v0  ;;  %1572 = vmatprep.subr.bf16.mxu1 %v1571_v61  ;;  %v868_v61 = vld [vmem:[#allocation7 + $0x1f0] sm:$0xff]  ;;  %v1535_v62 = vpack.c.bf16 %v825_v60, %v824_v59  ;;  %v809_v0 = vld [vmem:[#allocation7 + $0x18] sm:$0xff] }
  0x95   : > { %619 = vmatprep.mubr.f32.mxu0 %v2085_v20  ;;  %1532 = vmatprep.subr.bf16.mxu0 %v1531_v45  ;;  %v1537_v2 = vpack.c.bf16 %v809_v0, %v808_v63  ;;  %v1591_v3 = vpack.c.bf16 %v869_v1, %v868_v61  ;;  %v837_v45 = vld [vmem:[#allocation7 + $0xf8] sm:$0xff] }
  0x96   : > { %1462 = vmatmul.mubr.f32.gmra.mrb[4].mxu1 %v454_v5  ;;  %1534 = vmatpush3.bf16.msra.mxu0 %v1533_v51  ;;  %v853_v5 = vld [vmem:[#allocation7 + $0x178] sm:$0xff] }
  0x97   : > { %1464 = vmatprep.mubr.f32.mxu1 %v453_v8  ;;  %1574 = vmatpush3.bf16.msra.mxu1 %v1573_v7  ;;  %v1593_v6 = vpack.c.bf16 %v853_v5, %v852_v4  ;;  %v826_v7 = vld [vmem:[#allocation7 + $0xa0] sm:$0xff]  ;;  %v827_v8 = vld [vmem:[#allocation7 + $0xa8] sm:$0xff] }
  0x98   : > { %620 = vmatmul.mubr.f32.gmra.mrb[6].mxu0 %v416_v12  ;;  %1576 = vmatprep.subr.bf16.mxu1 %v1575_v9  ;;  %v1539_v9 = vpack.c.bf16 %v827_v8, %v826_v7  ;;  %v1541_v12 = vpack.c.bf16 %v811_v11, %v810_v10 }
  0x99   : > { %624 = vmatprep.mubr.f32.mxu0 %v2092_v26  ;;  %1536 = vmatprep.subr.bf16.mxu0 %v1535_v62 }
  0x9a   : > { %1465 = vmatmul.mubr.msk.f32.gmra.mrb[6].mxu1 %vm2147_vm4, %v460_v18  ;;  %1538 = vmatpush3.bf16.msra.mxu0 %v1537_v2  ;;  %v1543_v18 = vpack.c.bf16 %v829_v16, %v828_v14 }
  0x9b   : > { %1578 = vmatpush3.bf16.msra.mxu1 %v1577_v21  ;;  %1046 = vmatprep.mubr.f32.mxu1 %v2062_v48  ;;  %v412_v48 = vsel %vm411_vm1, %v409_v25, %v410_v19  ;;  %v866_v19 = vld [vmem:[#allocation7 + $0x1e0] sm:$0xff]  ;;  %v812_v21 = vld [vmem:[#allocation7 + $0x30] sm:$0xff]  ;;  %v831_v25 = vld [vmem:[#allocation7 + $0xc8] sm:$0xff] }
  0x9c   : > { %1216 = vmatmul.mubr.msk.f32.gmra.mrb[8].mxu0 %vm2156_vm5, %v415_v23  ;;  %1580 = vmatprep.subr.bf16.mxu1 %v1579_v31  ;;  %v1587_v54 = vpack.c.bf16 %v867_v50, %v866_v19  ;;  %v813_v23 = vld [vmem:[#allocation7 + $0x38] sm:$0xff]  ;;  %v832_v31 = vld [vmem:[#allocation7 + $0xd0] sm:$0xff] }
  0x9d   : > { %629 = vmatprep.mubr.f32.mxu0 %v2104_v33  ;;  %1540 = vmatprep.subr.bf16.mxu0 %v1539_v9  ;;  %v1545_v24 = vpack.c.bf16 %v813_v23, %v812_v21  ;;  %v1551_v34 = vpack.c.bf16 %v833_v32, %v832_v31  ;;  %v836_v19 = vld [vmem:[#allocation7 + $0xf0] sm:$0xff]  ;;  %v821_v50 = vld [vmem:[#allocation7 + $0x78] sm:$0xff] }
  0x9e   : > { %1542 = vmatpush3.bf16.msra.mxu0 %v1541_v12  ;;  %v1559_v47 = vpack.c.bf16 %v837_v45, %v836_v19  ;;  %v1561_v51 = vpack.c.bf16 %v821_v50, %v820_v49 }
  0x9f   : > { %1582 = vmatpush3.bf16.msra.mxu1 %v1581_v35  ;;  %1544 = vmatprep.subr.bf16.mxu0 %v1543_v18  ;;  %v816_v35 = vld [vmem:[#allocation7 + $0x50] sm:$0xff] }
  0xa0   : > { %630 = vmatmul.mubr.f32.gmra.mrb[10].mxu0 %v414_v53  ;;  %1584 = vmatprep.subr.bf16.mxu1 %v1583_v38  ;;  %v830_v53 = vld [vmem:[#allocation7 + $0xc0] sm:$0xff]  ;;  %v1553_v37 = vpack.c.bf16 %v817_v36, %v816_v35 }
  0xa1   : > { %634 = vmatprep.mubr.f32.mxu0 %v2115_v42  ;;  %v834_v38 = vld [vmem:[#allocation7 + $0xe0] sm:$0xff] }
  0xa2   : > { %1546 = vmatpush3.bf16.msra.mxu0 %v1545_v24  ;;  %v1555_v40 = vpack.c.bf16 %v835_v39, %v834_v38 }
  0xa3   : > { %1586 = vmatpush3.bf16.msra.mxu1 %v1585_v41  ;;  %v818_v41 = vld [vmem:[#allocation7 + $0x60] sm:$0xff] }
  0xa4   : > { %635 = vmatmul.mubr.f32.gmra.mrb[12].mxu0 %v413_v27  ;;  %1588 = vmatprep.subr.bf16.mxu1 %v1587_v54  ;;  %v1547_v27 = vpack.c.bf16 %v831_v25, %v830_v53  ;;  %v1557_v44 = vpack.c.bf16 %v819_v43, %v818_v41 }
  0xa5   : > { %639 = vmatprep.mubr.f32.mxu0 %v2076_v13 }
  0xa6   : > { %1548 = vmatprep.subr.bf16.mxu0 %v1547_v27 }
  0xa7   : > { %1590 = vmatpush3.bf16.msra.mxu1 %v1589_v58 }
  0xa8   : > { %640 = vmatmul.mubr.f32.gmra.mrb[14].mxu0 %v412_v48  ;;  %1592 = vmatprep.subr.bf16.mxu1 %v1591_v3  ;;  %v814_v48 = vld [vmem:[#allocation7 + $0x40] sm:$0xff] }
  0xa9   : > { %v1549_v29 = vpack.c.bf16 %v815_v28, %v814_v48 }
  0xab   : > { %1594 = vmatpush3.bf16.msra.mxu1 %v1593_v6  ;;  %1550 = vmatpush3.bf16.msra.mxu0 %v1549_v29 }
  0xac   : > { %1552 = vmatprep.subr.bf16.mxu0 %v1551_v34 }
  0xaf   : > { %1554 = vmatpush3.bf16.msra.mxu0 %v1553_v37 }
  0xb0   : > { %1556 = vmatprep.subr.bf16.mxu0 %v1555_v40 }
  0xb3   : > { %1558 = vmatpush3.bf16.msra.mxu0 %v1557_v44 }
  0xb4   : > { %1560 = vmatprep.subr.bf16.mxu0 %v1559_v47 }
  0xb7   : > { %1562 = vmatpush3.bf16.msra.mxu0 %v1561_v51 }
 0x15f   : > { %v1263_v54 = vpop.f32.mrb[0].mxu0 }
 0x160   : > { %v1264_v56 = vpop.f32.mrb[1].mxu0 }
 0x161   : > { %v1265_v58 = vadd.f32 %v1264_v56, %v1263_v54  ;;  %v1457_v59 = vpop.f32.mrb[0].mxu1 }
 0x162   : > { %v711_v60 = vpop.f32.mrb[1].mxu1 }
 0x163   : > { %v1266_v61 = vpop.f32.mrb[2].mxu0  ;;  %v607_v62 = vadd.f32 %v1265_v58, %v2183_v57 }
 0x164   : > { %v1267_v63 = vpop.f32.mrb[3].mxu0 }
 0x165   : > { %v1268_v0 = vadd.f32 %v1267_v63, %v1266_v61  ;;  %v712_v1 = vadd.f32 %v711_v60, %v607_v62  ;;  %v1460_v2 = vpop.f32.mrb[2].mxu1 }
 0x166   : > { %v721_v3 = vpop.f32.mrb[3].mxu1 }
 0x167   : > { %v612_v4 = vadd.f32 %v1268_v0, %v2183_v57  ;;  %v2187_v5 = vmax.f32 %v712_v1, 0.0  ;;  %v1269_v6 = vpop.f32.mrb[4].mxu0 }
 0x168   : > { %v1270_v7 = vpop.f32.mrb[5].mxu0 }
 0x169   : > { %v717_v8 = vadd.f32 %v1457_v59, %v612_v4  ;;  %v1271_v9 = vadd.f32 %v1270_v7, %v1269_v6  ;;  %941 = vmatprep.mubr.f32.mxu0 %v2187_v5  ;;  %v1463_v10 = vpop.f32.mrb[4].mxu1  ;;  %v758_v18 = vrot.slane %v2187_v5, 7  ;;  %v782_v21 = vrot.slane %v2187_v5, 1 }
 0x16a   : > { %v731_v11 = vpop.f32.mrb[5].mxu1 }
 0x16b   : > { %v2190_v12 = vmax.f32 %v717_v8, 0.0  ;;  %v1272_v14 = vpop.f32.mrb[6].mxu0  ;;  %v617_v16 = vadd.f32 %v1271_v9, %v2183_v57 }
 0x16c   : > { %v1273_v23 = vpop.f32.mrb[7].mxu0 }
 0x16d   : > { %v783_v24 = vrot.slane %v2190_v12, 1  ;;  %v1274_v53 = vadd.f32 %v1273_v23, %v1272_v14  ;;  %v722_v25 = vadd.f32 %v721_v3, %v617_v16  ;;  %v1466_v27 = vpop.f32.mrb[6].mxu1  ;;  %v759_v48 = vrot.slane %v2190_v12, 7 }
 0x16e   : > { %v741_v28 = vpop.f32.mrb[7].mxu1 }
 0x16f   : > { %v622_v29 = vadd.f32 %v1274_v53, %v2183_v57  ;;  %v2198_v31 = vmax.f32 %v722_v25, 0.0  ;;  %v1275_v32 = vpop.f32.mrb[8].mxu0  ;;  %v796_v34 = vsel %vm452_vm0, %v782_v21, %v783_v24  ;;  %v2208_v35 = vsel %vm411_vm1, %v758_v18, %v759_v48 }
 0x170   : > { %v1276_v36 = vpop.f32.mrb[9].mxu0  ;;  %1047 = vmatmul.mubr.f32.vlgmr.msra.gmra.mrb[8].mxu1 %v796_v34 }
 0x171   : > { %v727_v37 = vadd.f32 %v1460_v2, %v622_v29  ;;  %v760_v38 = vrot.slane %v2198_v31, 7  ;;  %v784_v39 = vrot.slane %v2198_v31, 1  ;;  %v1277_v40 = vadd.f32 %v1276_v36, %v1275_v32  ;;  %1051 = vmatprep.mubr.f32.mxu1 %v2067_v52 }
 0x173   : > { %v2213_v41 = vmax.f32 %v727_v37, 0.0  ;;  %v1278_v43 = vpop.f32.mrb[10].mxu0  ;;  %v627_v44 = vadd.f32 %v1277_v40, %v2183_v57  ;;  %v795_v19 = vsel %vm452_vm0, %v783_v24, %v784_v39  ;;  %v771_v45 = vsel %vm411_vm1, %v759_v48, %v760_v38 }
 0x174   : > { %v1279_v47 = vpop.f32.mrb[11].mxu0  ;;  %1052 = vmatmul.mubr.f32.gmra.mrb[10].mxu1 %v795_v19 }
 0x175   : > { %v1280_v49 = vadd.f32 %v1279_v47, %v1278_v43  ;;  %v732_v50 = vadd.f32 %v731_v11, %v627_v44  ;;  %1056 = vmatprep.mubr.f32.mxu1 %v2079_v15  ;;  %v785_v51 = vrot.slane %v2213_v41, 1  ;;  %v761_v52 = vrot.slane %v2213_v41, 7  ;;  %v1219_v44 = vld [vmem:[%s2341_s4] ss:$0 sm:$0xff] }
 0x177   : > { %v632_v54 = vadd.f32 %v1280_v49, %v2183_v57  ;;  %v754_v56 = vmax.f32 %v732_v50, 0.0  ;;  %v1281_v58 = vpop.f32.mrb[12].mxu0  ;;  %v794_v59 = vsel %vm452_vm0, %v784_v39, %v785_v51  ;;  %v770_v60 = vsel %vm411_vm1, %v760_v38, %v761_v52 }
 0x178   : > { %v1282_v61 = vpop.f32.mrb[13].mxu0  ;;  %1057 = vmatmul.mubr.f32.gmra.mrb[12].mxu1 %v794_v59 }
 0x179   : > { %v737_v62 = vadd.f32 %v1463_v10, %v632_v54  ;;  %v762_v63 = vrot.slane %v754_v56, 7  ;;  %v786_v0 = vrot.slane %v754_v56, 1  ;;  %v1283_v15 = vadd.f32 %v1282_v61, %v1281_v58  ;;  %1061 = vmatprep.mubr.f32.mxu1 %v2085_v20 }
 0x17b   : > { %v755_v1 = vmax.f32 %v737_v62, 0.0  ;;  %v1284_v2 = vpop.f32.mrb[14].mxu0  ;;  %v637_v3 = vadd.f32 %v1283_v15, %v2183_v57  ;;  %v793_v4 = vsel %vm452_vm0, %v785_v51, %v786_v0  ;;  %v769_v6 = vsel %vm411_vm1, %v761_v52, %v762_v63 }
 0x17c   : > { %v1285_v7 = vpop.f32.mrb[15].mxu0  ;;  %1222 = vmatmul.mubr.msk.f32.gmra.mrb[14].mxu1 %vm2122_vm3, %v793_v4 }
 0x17d   : > { %v1286_v8 = vadd.f32 %v1285_v7, %v1284_v2  ;;  %v742_v9 = vadd.f32 %v741_v28, %v637_v3  ;;  %1066 = vmatprep.mubr.f32.mxu1 %v2092_v26  ;;  %v787_v10 = vrot.slane %v755_v1, 1  ;;  %v763_v20 = vrot.slane %v755_v1, 7 }
 0x17f   : > { %v642_v11 = vadd.f32 %v1286_v8, %v2183_v57  ;;  %v756_v14 = vmax.f32 %v742_v9, 0.0  ;;  %v792_v16 = vsel %vm452_vm0, %v786_v0, %v787_v10  ;;  %v768_v23 = vsel %vm411_vm1, %v762_v63, %v763_v20 }
 0x180   : > { %1067 = vmatmul.mubr.f32.gmra.mrb[16].mxu1 %v792_v16 }
 0x181   : > { %v747_v24 = vadd.f32 %v1466_v27, %v642_v11  ;;  %v764_v53 = vrot.slane %v756_v14, 7  ;;  %v788_v55 = vrot.slane %v756_v14, 1  ;;  %1071 = vmatprep.mubr.f32.mxu1 %v2104_v33 }
 0x183   : > { %v757_v25 = vmax.f32 %v747_v24, 0.0  ;;  %v791_v26 = vsel %vm452_vm0, %v787_v10, %v788_v55  ;;  %v767_v57 = vsel %vm411_vm1, %v763_v20, %v764_v53 }
 0x184   : > { %1072 = vmatmul.mubr.f32.gmra.mrb[18].mxu1 %v791_v26 }
 0x185   : > { %v765_v48 = vrot.slane %v757_v25, 7  ;;  %1076 = vmatprep.mubr.f32.mxu1 %v2115_v42  ;;  %v789_v28 = vrot.slane %v757_v25, 1 }
 0x187   : > { %v773_v27 = vsel %vm411_vm1, %v765_v48, %v758_v18  ;;  %v790_v33 = vsel %vm452_vm0, %v788_v55, %v789_v28  ;;  %v797_v29 = vsel %vm452_vm0, %v789_v28, %v782_v21  ;;  %v766_v32 = vsel %vm411_vm1, %v764_v53, %v765_v48 }
 0x188   : > { %1220 = vmatmul.mubr.msk.f32.vlgmr.msra.gmra.mrb[16].mxu0 %vm2094_vm2, %v773_v27  ;;  %1077 = vmatmul.mubr.f32.gmra.mrb[20].mxu1 %v790_v33 }
 0x189   : > { %946 = vmatprep.mubr.f32.mxu0 %v2190_v12  ;;  %1081 = vmatprep.mubr.f32.mxu1 %v2076_v13 }
 0x18c   : > { %947 = vmatmul.mubr.f32.gmra.mrb[18].mxu0 %v2208_v35  ;;  %1223 = vmatmul.mubr.msk.f32.gmra.mrb[22].mxu1 %vm2147_vm4, %v797_v29 }
 0x18d   : > { %951 = vmatprep.mubr.f32.mxu0 %v2198_v31 }
 0x190   : > { %952 = vmatmul.mubr.f32.gmra.mrb[20].mxu0 %v771_v45 }
 0x191   : > { %956 = vmatprep.mubr.f32.mxu0 %v2213_v41 }
 0x194   : > { %957 = vmatmul.mubr.f32.gmra.mrb[22].mxu0 %v770_v60 }
 0x195   : > { %961 = vmatprep.mubr.f32.mxu0 %v754_v56 }
 0x198   : > { %1221 = vmatmul.mubr.msk.f32.gmra.mrb[24].mxu0 %vm2156_vm5, %v769_v6 }
 0x199   : > { %966 = vmatprep.mubr.f32.mxu0 %v755_v1 }
 0x19c   : > { %967 = vmatmul.mubr.f32.gmra.mrb[26].mxu0 %v768_v23 }
 0x19d   : > { %971 = vmatprep.mubr.f32.mxu0 %v756_v14 }
 0x1a0   : > { %972 = vmatmul.mubr.f32.gmra.mrb[28].mxu0 %v767_v57 }
 0x1a1   : > { %976 = vmatprep.mubr.f32.mxu0 %v757_v25 }
 0x1a4   : > { %977 = vmatmul.mubr.f32.gmra.mrb[30].mxu0 %v766_v32 }
 0x243   : > { %v1399_v46 = vpop.f32.mrb[8].mxu1 }
 0x244   : > { %v1400_v13 = vpop.f32.mrb[9].mxu1 }
 0x245   : > { %v1401_v30 = vadd.f32 %v1400_v13, %v1399_v46 }
 0x247   : > { %v1402_v42 = vpop.f32.mrb[10].mxu1 }
 0x248   : > { %v1403_v17 = vpop.f32.mrb[11].mxu1 }
 0x249   : > { %v1404_v5 = vadd.f32 %v1403_v17, %v1402_v42 }
 0x24b   : > { %v1405_v12 = vpop.f32.mrb[12].mxu1 }
 0x24c   : > { %v1406_v18 = vpop.f32.mrb[13].mxu1 }
 0x24d   : > { %v1407_v21 = vadd.f32 %v1406_v18, %v1405_v12 }
 0x24f   : > { %v1408_v31 = vpop.f32.mrb[14].mxu1 }
 0x250   : > { %v1409_v34 = vpop.f32.mrb[15].mxu1 }
 0x251   : > { %v1410_v35 = vadd.f32 %v1409_v34, %v1408_v31 }
 0x253   : > { %v1411_v22 = vpop.f32.mrb[16].mxu1 }
 0x254   : > { %v1412_v36 = vpop.f32.mrb[17].mxu1 }
 0x255   : > { %v1413_v37 = vadd.f32 %v1412_v36, %v1411_v22 }
 0x257   : > { %v1414_v38 = vpop.f32.mrb[18].mxu1 }
 0x258   : > { %v1415_v39 = vpop.f32.mrb[19].mxu1 }
 0x259   : > { %v1416_v40 = vadd.f32 %v1415_v39, %v1414_v38 }
 0x25b   : > { %v1343_v41 = vpop.f32.mrb[16].mxu0  ;;  %v1417_v43 = vpop.f32.mrb[20].mxu1 }
 0x25c   : > { %v1344_v19 = vpop.f32.mrb[17].mxu0  ;;  %v1418_v45 = vpop.f32.mrb[21].mxu1 }
 0x25d   : > { %v1345_v47 = vadd.f32 %v1344_v19, %v1343_v41  ;;  %v1419_v49 = vadd.f32 %v1418_v45, %v1417_v43 }
 0x25f   : > { %v944_v50 = vadd.f32 %v1345_v47, %v1219_v44  ;;  %v1346_v51 = vpop.f32.mrb[18].mxu0  ;;  %v1420_v52 = vpop.f32.mrb[22].mxu1 }
 0x260   : > { %v1347_v54 = vpop.f32.mrb[19].mxu0  ;;  %v1421_v56 = vpop.f32.mrb[23].mxu1 }
 0x261   : > { %v1049_v58 = vadd.f32 %v1401_v30, %v944_v50  ;;  %v1348_v59 = vadd.f32 %v1347_v54, %v1346_v51  ;;  %v1422_v60 = vadd.f32 %v1421_v56, %v1420_v52 }
 0x263   : > { %1087 = vst [vmem:[%s2276_s10] sm:$0xff] %v1049_v58  ;;  %v949_v61 = vadd.f32 %v1348_v59, %v1219_v44  ;;  %v1349_v62 = vpop.f32.mrb[20].mxu0 }
 0x264   : > { %v1350_v63 = vpop.f32.mrb[21].mxu0 }
 0x265   : > { %v1054_v0 = vadd.f32 %v1404_v5, %v949_v61  ;;  %v1351_v15 = vadd.f32 %v1350_v63, %v1349_v62 }
 0x267   : > { %1088 = vst [vmem:[%s2276_s10 + $0x8] sm:$0xff] %v1054_v0  ;;  %v954_v1 = vadd.f32 %v1351_v15, %v1219_v44  ;;  %v1352_v2 = vpop.f32.mrb[22].mxu0 }
 0x268   : > { %v1353_v3 = vpop.f32.mrb[23].mxu0 }
 0x269   : > { %v1059_v4 = vadd.f32 %v1407_v21, %v954_v1  ;;  %v1354_v6 = vadd.f32 %v1353_v3, %v1352_v2 }
 0x26b   : > { %1089 = vst [vmem:[%s2276_s10 + $0x10] sm:$0xff] %v1059_v4  ;;  %v959_v7 = vadd.f32 %v1354_v6, %v1219_v44  ;;  %v1355_v8 = vpop.f32.mrb[24].mxu0 }
 0x26c   : > { %v1356_v9 = vpop.f32.mrb[25].mxu0 }
 0x26d   : > { %v1064_v10 = vadd.f32 %v1410_v35, %v959_v7  ;;  %v1357_v20 = vadd.f32 %v1356_v9, %v1355_v8 }
 0x26f   : > { %1090 = vst [vmem:[%s2276_s10 + $0x18] sm:$0xff] %v1064_v10  ;;  %v964_v11 = vadd.f32 %v1357_v20, %v1219_v44  ;;  %v1358_v14 = vpop.f32.mrb[26].mxu0 }
 0x270   : > { %v1359_v16 = vpop.f32.mrb[27].mxu0 }
 0x271   : > { %v1069_v23 = vadd.f32 %v1413_v37, %v964_v11  ;;  %v1360_v24 = vadd.f32 %v1359_v16, %v1358_v14 }
 0x273   : > { %1091 = vst [vmem:[%s2276_s10 + $0x20] sm:$0xff] %v1069_v23  ;;  %v969_v53 = vadd.f32 %v1360_v24, %v1219_v44  ;;  %v1361_v55 = vpop.f32.mrb[28].mxu0 }
 0x274   : > { %v1362_v25 = vpop.f32.mrb[29].mxu0 }
 0x275   : > { %v1074_v26 = vadd.f32 %v1416_v40, %v969_v53  ;;  %v1363_v57 = vadd.f32 %v1362_v25, %v1361_v55 }
 0x277   : > { %1092 = vst [vmem:[%s2276_s10 + $0x28] sm:$0xff] %v1074_v26  ;;  %v974_v48 = vadd.f32 %v1363_v57, %v1219_v44  ;;  %v1364_v28 = vpop.f32.mrb[30].mxu0 }
 0x278   : > { %v1365_v27 = vpop.f32.mrb[31].mxu0 }
 0x279   : > { %v1079_v33 = vadd.f32 %v1419_v49, %v974_v48  ;;  %v1366_v29 = vadd.f32 %v1365_v27, %v1364_v28 }
 0x27b   : > { %1093 = vst [vmem:[%s2276_s10 + $0x30] sm:$0xff] %v1079_v33  ;;  %v979_v32 = vadd.f32 %v1366_v29, %v1219_v44 }
 0x27d   : > { %v1084_v46 = vadd.f32 %v1422_v60, %v979_v32 }
 0x27f   : > { %1094 = vst [vmem:[%s2276_s10 + $0x38] sm:$0xff] %v1084_v46 }
 0x280   : > { %1765 = shalt.err (!%p1762_p1)
}
 0x281   : > { %s1766_s12 = scalar_lea.hbm %s2290_s11, 1024  ;;  %s1770_s15 = scalar_lea.hbm %s2342_s5, 2048 }
 0x282   : > { %p1767_p13 = scmp.ne.s32.totalorder %s2290_s11, %s1766_s12  ;;  %p1771_p4 = scmp.lt.u32.totalorder %s2290_s11, %s2342_s5 }
 0x283   : > { %p1772_p5 = scmp.lt.u32.totalorder %s1770_s15, %s1766_s12  ;;  %p1774_p11 = scmp.lt.u32.totalorder %s1766_s12, %s2290_s11 }
 0x284   : > { %p1768_p6 = pnand %p1767_p13, %p2364_p0 }
 0x285   : > { %p1773_p8 = por %p1772_p5, %p1771_p4 }
 0x286   : > { %p1769_p10 = pneg %p1768_p6 }
 0x287   : > { %p1775_p2 = por %p1774_p11, %p1773_p8 }
 0x289   : > { %p1776_p3 = pnand %p1775_p2, %p1769_p10 }
 0x28b   : > { %1779 = shalt.err (!%p1776_p3)
}
 0x28c   : > { %s1830_s28 = smov 128   ;;  %s1831_s9 = smov 8  }
 0x28d   : > { %1605 = dma.vmem_to_hbm [thread:$0]  (%p2364_p0), %s2292_s13, 1024, %s2290_s11, %s1096_s17, %s1830_s28, %s1830_s28, %s1831_s9  }
 0x28e PF: > { %s1124_s30 = sand.u32 1, %s1810_s18   ;;  %p2365_p7 = scmp.ne.s32.totalorder %s2347_s25, 0 }
 0x28f   : > { %p2366_p9 = scmp.ge.s32.totalorder %s1822_s21, 2  ;;  %s1125_s7 = scalar_lea.sflag [#allocation4], %s1124_s30 }
 0x291   : > { %p1619_p12 = pnand %p2366_p9, %p2365_p7 }
 0x293   : > { %1805 = dma.done.wait (!%p1619_p12), %s1125_s7, 1024  }
 0x294   : > { %1807 = vsyncadd (!%p1619_p12), %s1125_s7, 4294966272  ;;  %p19_p1 = scmp.ge.s32.totalorder %s1978_s29, 4   ;;  %s2367_s18 = smov %s1814_s19 }
 0x295   : > { %s2368_s19 = smov %s1818_s20  ;;  %s2369_s20 = smov %s1994_s27 }
 0x296   : > { %s2370_s21 = smov %s1978_s29  ;;  %21 = sbr.rel (!%p19_p1) target bundleno = 6 (0x6), region = 93 }
 0x29d   :  { %1130 = vsyncpa [#allocation3], 1 }
 0x29e   :  { %1132 = vsyncpa [#allocation3 + $0x1], 1 }
 0x29f   :  { %1133 = vsyncpa [#allocation6], 1 }
 0x2a0   :  { %1134 = vsyncpa [#allocation4], 1 }
 0x2a1   :  { %1136 = vsyncpa [#allocation4 + $0x1], 1 }

</bundles_post_ra>
